<compile_context>
chip_gen: v7x
topology: tpu7x:2x2x1
jax: 0.10.0
libtpu: 0.0.40
codegen_flags: <defaults>
</compile_context>

<pallas_src>
import jax
import jax.numpy as jnp
from jax.experimental import pallas as pl
from jax.experimental.pallas import tpu as pltpu


_F = 8                 # input features (nn.Linear(8, 1))
_ROW = 128             # samples packed per lane-dense row
_WIDTH = _ROW * _F     # 1024 lanes per packed row


def _logistic_kernel(x_ref, w_ref, b_ref, o_ref):
    """One batch tile of sigmoid(x @ w.T + b), fully lane-dense.

    x_ref: (TB, 1024)  128 packed samples per row (8 features each)
    w_ref: (1024, 128) block-diagonal expanded weights (constant, resident)
    b_ref: (1, 1)      bias scalar in SMEM
    o_ref: (TB, 128)   one sigmoid per packed sample, row-major sample order
    """
    # Fused per-sample dot product + 128-wide segmented reduction as a single
    # MXU contraction; f32 accumulation regardless of the input dtype.
    z = jnp.dot(x_ref[...], w_ref[...], preferred_element_type=jnp.float32)
    z = z + b_ref[0, 0]                        # scalar broadcast from SMEM
    # Exact sigmoid (the approximate reciprocal caused the earlier mismatch).
    # exp -> EUP, divide -> VPU; both idle in this HBM-bound kernel.
    o_ref[...] = (1.0 / (1.0 + jnp.exp(-z))).astype(o_ref.dtype)


def _round_up(n, m):
    return ((n + m - 1) // m) * m


def binary_classifier(x, w, b, *, block_rows=2048):
    """sigmoid(x @ w.T + b) with PyTorch nn.Linear(8, 1) parameter layout.

    x: (B, 8) f32 or bf16, w: (1, 8), b: (1,)  ->  (B, 1) in x.dtype.
    block_rows: packed rows per grid step (128 samples each).
    """
    B, F = x.shape
    assert F == _F, "BinaryClassifier expects 8 input features"
    assert block_rows >= 16 and block_rows % 16 == 0

    out_dtype = x.dtype
    w32 = jnp.asarray(w, jnp.float32).reshape(F)
    b32 = jnp.asarray(b, jnp.float32).reshape(())

    # Peel the ragged tail (< 128 samples) into a tiny plain-JAX epilogue
    # instead of padding x up to a grid multiple.  When B % 128 == 0 the
    # kernel input is a pure zero-copy reshape view of x.
    B_main = (B // _ROW) * _ROW
    pieces = []

    if B_main:
        R = B_main // _ROW                              # packed rows
        x_main = x if B_main == B else x[:B_main]
        x_packed = x_main.reshape(R, _WIDTH)            # zero-copy, lane-dense

        # Block-diagonal expanded weights: w_exp[8*q + f, q] = w[f].
        # (TB,1024) @ (1024,128) == per-sample dot + 128-way segment sum, and
        # the result is already lane-dense — no in-kernel reshape needed.
        w_col = w32.astype(x.dtype).reshape(F, 1)
        w_exp = jnp.kron(jnp.eye(_ROW, dtype=x.dtype), w_col)   # (1024, 128)
        b_smem = b32.reshape(1, 1)

        # >= 4 grid steps when possible: DMA pipeline depth + dual-TC sharding
        # on v7x via the "parallel" batch axis.
        tb = min(block_rows, _round_up(pl.cdiv(R, 4), 16))
        n_blocks = pl.cdiv(R, tb)                       # last block may be partial

        out_packed = pl.pallas_call(
            _logistic_kernel,
            out_shape=jax.ShapeDtypeStruct((R, _ROW), out_dtype),
            grid_spec=pltpu.PrefetchScalarGridSpec(
                num_scalar_prefetch=0,
                grid=(n_blocks,),
                in_specs=[
                    pl.BlockSpec((tb, _WIDTH), lambda i: (i, 0)),      # x tile
                    # Constant index_map -> fetched once, stays resident.
                    pl.BlockSpec((_WIDTH, _ROW), lambda i: (0, 0)),    # weights
                    pl.BlockSpec(memory_space=pltpu.MemorySpace.SMEM),  # bias
                ],
                out_specs=pl.BlockSpec((tb, _ROW), lambda i: (i, 0)),
            ),
            compiler_params=pltpu.CompilerParams(
                dimension_semantics=("parallel",),      # shard across TCs (v7x)
                vmem_limit_bytes=32 * 1024 * 1024,      # safe on v5e/v6e/v7x
            ),
        )(x_packed, w_exp, b_smem)

        # Row-major sample order is preserved -> free reshape back to (B_main, 1).
        pieces.append(out_packed.reshape(B_main, 1))

    if B > B_main:                                      # < 128 leftover samples
        x_tail = x[B_main:].astype(jnp.float32)
        z_tail = jnp.sum(x_tail * w32[None, :], axis=1, keepdims=True) + b32
        pieces.append(jax.nn.sigmoid(z_tail).astype(out_dtype))

    return pieces[0] if len(pieces) == 1 else jnp.concatenate(pieces, axis=0)


if __name__ == "__main__":
    key = jax.random.PRNGKey(0)
    kx, kw, kb = jax.random.split(key, 3)

    # B = 5000 exercises a 3-step grid, a partial last block, and the tail epilogue.
    B, F = 5000, 8
    x = jax.random.normal(kx, (B, F), dtype=jnp.float32)
    bound = 1.0 / jnp.sqrt(jnp.float32(F))   # PyTorch default init range
    w = jax.random.uniform(kw, (1, F), minval=-bound, maxval=bound,
                           dtype=jnp.float32)
    b = jax.random.uniform(kb, (1,), minval=-bound, maxval=bound,
                           dtype=jnp.float32)

    # Small block_rows so the demo runs a multi-step, pipelined grid.
    out = jax.block_until_ready(binary_classifier(x, w, b, block_rows=16))

    # Exact-f32 reference (elementwise mul + sum: no MXU precision ambiguity).
    z_ref = jnp.sum(x * w, axis=1, keepdims=True) + b
    ref = jax.nn.sigmoid(z_ref)
    assert out.shape == (B, 1) and out.dtype == jnp.float32
    # 5e-3 comfortably covers any f32-matmul pass-decomposition on the MXU.
    assert jnp.allclose(out, ref, atol=5e-3), "f32 mismatch vs reference"

    # bf16 input path: halves the dominant HBM read stream (f32 accumulation).
    out_bf16 = jax.block_until_ready(
        binary_classifier(x.astype(jnp.bfloat16), w, b, block_rows=16))
    assert out_bf16.dtype == jnp.bfloat16
    assert jnp.allclose(out_bf16.astype(jnp.float32), ref, atol=2e-2), \
        "bf16 mismatch vs reference"

    print("KERNEL_OK")
</pallas_src>

<mosaic_0001>
module attributes {stable_mosaic.version = 11 : i64} {
  func.func @_logistic_kernel(%arg0: i32, %arg1: memref<16x1024xf32, #tpu.memory_space<vmem>>, %arg2: memref<1024x128xf32, #tpu.memory_space<vmem>>, %arg3: memref<1x1xf32, #tpu.memory_space<smem>>, %arg4: memref<16x128xf32, #tpu.memory_space<vmem>>) attributes {dimension_semantics = [#tpu.dimension_semantics<parallel>], iteration_bounds = array<i64: 3>, scalar_prefetch = 0 : i64, scratch_operands = 0 : i64, tpu.core_type = #tpu.core_type<tc>, window_params = [{transform_indices = @transform_0, window_bounds = array<i64: 16, 1024>}, {pipeline_mode = #tpu.pipeline_mode<synchronous>, transform_indices = @transform_1, window_bounds = array<i64: 1024, 128>}, {transform_indices = @transform_2, window_bounds = array<i64: 1, 1>}, {transform_indices = @transform_3, window_bounds = array<i64: 16, 128>}]} {
    %c0 = arith.constant 0 : index
    %c0_0 = arith.constant 0 : index
    %0 = vector.load %arg1[%c0, %c0_0] : memref<16x1024xf32, #tpu.memory_space<vmem>>, vector<16x1024xf32>
    %c0_1 = arith.constant 0 : index
    %c0_2 = arith.constant 0 : index
    %1 = vector.load %arg2[%c0_1, %c0_2] : memref<1024x128xf32, #tpu.memory_space<vmem>>, vector<1024x128xf32>
    %cst = arith.constant dense<0.000000e+00> : vector<16x128xf32>
    %2 = tpu.matmul %0, %1, %cst {dimension_numbers = #tpu.dot_dimension_numbers<[1], [0], [0], [1], [0, 0, 1, 1], [], []>} : vector<16x1024xf32>, vector<1024x128xf32>, vector<16x128xf32> -> vector<16x128xf32>
    %c0_3 = arith.constant 0 : index
    %c0_4 = arith.constant 0 : index
    %3 = memref.load %arg3[%c0_3, %c0_4] : memref<1x1xf32, #tpu.memory_space<smem>>
    %4 = vector.broadcast %3 : f32 to vector<16x128xf32>
    %5 = arith.addf %2, %4 : vector<16x128xf32>
    %cst_5 = arith.constant 0.000000e+00 : f32
    %6 = vector.broadcast %cst_5 : f32 to vector<16x128xf32>
    %7 = arith.subf %6, %5 : vector<16x128xf32>
    %8 = math.exp %7 : vector<16x128xf32>
    %cst_6 = arith.constant 1.000000e+00 : f32
    %9 = vector.broadcast %cst_6 : f32 to vector<16x128xf32>
    %10 = arith.addf %9, %8 : vector<16x128xf32>
    %cst_7 = arith.constant 1.000000e+00 : f32
    %11 = vector.broadcast %cst_7 : f32 to vector<16x128xf32>
    %12 = arith.divf %11, %10 : vector<16x128xf32>
    %c0_8 = arith.constant 0 : index
    %c0_9 = arith.constant 0 : index
    %13 = vector.load %arg4[%c0_8, %c0_9] : memref<16x128xf32, #tpu.memory_space<vmem>>, vector<16x128xf32>
    tpu.vector_store %arg4[%c0_8, %c0_9], %12 {strides = array<i32>} : memref<16x128xf32, #tpu.memory_space<vmem>>, vector<16x128xf32>,
    return
  }
  func.func @transform_0(%arg0: i32) -> (i32, i32) {
    %c0_i32 = arith.constant 0 : i32
    %c0_i32_0 = arith.constant 0 : i32
    return %arg0, %c0_i32 : i32, i32
  }
  func.func @transform_1(%arg0: i32) -> (i32, i32) {
    %c0_i32 = arith.constant 0 : i32
    %c0_i32_0 = arith.constant 0 : i32
    %c0_i32_1 = arith.constant 0 : i32
    return %c0_i32, %c0_i32_0 : i32, i32
  }
  func.func @transform_2(%arg0: i32) -> (i32, i32) {
    %c0_i32 = arith.constant 0 : i32
    %c0_i32_0 = arith.constant 0 : i32
    %c0_i32_1 = arith.constant 0 : i32
    return %c0_i32, %c0_i32_0 : i32, i32
  }
  func.func @transform_3(%arg0: i32) -> (i32, i32) {
    %c0_i32 = arith.constant 0 : i32
    %c0_i32_0 = arith.constant 0 : i32
    return %arg0, %c0_i32 : i32, i32
  }
}

</mosaic_0001>

<bundles_post_ra>
// kernel: tpu_custom_call.1
= control target key start
LH: loop header
LB: loop body
LE: loop exit
PB: predicated region body
PF: predicated region fallthrough
CT: control target
= control target key end

     0   :  { %s1549_s0 = inlined_call_operand.hbm [shape: f32[39,1024], index: 0, kind: input, shape index: {}]   ;;  %s1550_s1 = inlined_call_operand.hbm [shape: f32[1024,128], index: 1, kind: input, shape index: {}]   ;;  %s1551_s2 = inlined_call_operand.<no memory space> [shape: f32[1,1], index: 2, kind: input, shape index: {}]   ;;  %s1552_s3 = inlined_call_operand.hbm [shape: f32[39,128], index: 3, kind: output, shape index: {}]  }
   0x1   :  { %8 = sst [smem:[#allocation2]] %s1551_s2 }
   0x2   :  { %9 = vsyncpa [#allocation4], 0 }
   0x3   :  { %11 = vsyncpa [#allocation4 + $0x1], 0 }
   0x4   :  { %12 = vsyncpa [#allocation7], 0 }
   0x5   :  { %13 = vsyncpa [#allocation5], 0 }
   0x6   :  { %15 = vsyncpa [#allocation5 + $0x1], 0  ;;  %s1321_s14 = smov 0   ;;  %s1323_s15 = smov 0  }
   0x7   :  { %s1325_s16 = smov 0   ;;  %s1327_s17 = smov 0  }
   0x8 LB: > { %s1342_s2 = sadd.s32 4294967295, %s1287_s17   ;;  %s787_s18 = sadd.s32 4294967294, %s1287_s17   ;;  %s1287_s17 = sphi %s1327_s17, %s1572_s17   ;;  %s1283_s16 = sphi %s1325_s16, %s1571_s16   ;;  %s1279_s15 = sphi %s1323_s15, %s1570_s15   ;;  %s1275_s14 = sphi %s1321_s14, %s1569_s14  }
   0x9   : > { %s1346_s19 = sadd.s32 1, %s1287_s17   ;;  %s28_s20 = sadd.s32 1, %s1283_s16 }
   0xa   : > { %s25_s21 = ssub.s32 %s1287_s17, %s1346_s19  ;;  %p35_p0 = scmp.ne.s32.totalorder %s1283_s16, %s1279_s15 }
   0xb   : > { %p26_p1 = scmp.eq.s32.totalorder %s25_s21, 0  ;;  %p36_p2 = scmp.eq.s32.totalorder %s1287_s17, 0 }
   0xc   : > { %p41_p3 = scmp.ne.s32.totalorder %s1279_s15, %s1275_s14  ;;  %p1553_p4 = scmp.eq.s32.totalorder %s1342_s2, 0 }
   0xd   : > { %s1358_s22 = scalar_select %p26_p1, %s1283_s16, %s28_s20  }
   0xe   : > { %p1360_p5 = por %p36_p2, %p35_p0  ;;  %p1366_p6 = por %p1553_p4, %p41_p3 }
   0xf   : > { %p107_p7 = scmp.eq.s32.totalorder %s1342_s2, 2  ;;  %p113_p8 = scmp.eq.s32.totalorder %s787_s18, 2 }
  0x10   : > { %s1556_s23 = scalar_select %p1360_p5, 1, 0 }
  0x11   : > { %s1557_s24 = scalar_select %p1366_p6, 1, 0 }
  0x12   : > { %p788_p9 = scmp.ge.s32.totalorder %s1287_s17, 1  ;;  %p120_p10 = scmp.lt.s32.totalorder %s1287_s17, 4 }
  0x13   : > { %p1373_p11 = por %p107_p7, %p35_p0  ;;  %p1377_p12 = por %p113_p8, %p41_p3 }
  0x14   : > { %p1381_p13 = pnand %p788_p9, %p120_p10  ;;  %s1289_s28 = smov [#allocation6]  }
  0x15   : > { %s1558_s25 = scalar_select %p1373_p11, 1, 0 }
  0x16   : > { %s1559_s26 = scalar_select %p1377_p12, 1, 0 }
  0x17   : > { %s1560_s27 = scalar_select %p1381_p13, 1, 0 }
  0x18   : > { %p1103_p1 = pneg %p1381_p13  ;;  %s132_s29 = sshll.u32 %s1289_s28, 4  ;;  %s133_s29 = int_to_ptr.vmem [resolvable:$true] %s132_s29 }
  0x19   : > { %s1161_s6 = scalar_lea.hbm %s1550_s1, 16384 }
  0x1a   : > { %p1389_p2 = pnand %p1103_p1, %p1553_p4  ;;  %p1162_p0 = scmp.ne.s32.totalorder %s1550_s1, %s1161_s6 }
  0x1b   : > { %p1168_p9 = scmp.lt.u32.totalorder %s1161_s6, %s1550_s1 }
  0x1c   : > { %p1163_p3 = pneg %p1389_p2 }
  0x1e   : > { %p1164_p7 = pnand %p1163_p3, %p1162_p0 }
  0x20   : > { %p1165_p8 = pneg %p1164_p7 }
  0x22   : > { %p1170_p10 = pnand %p1168_p9, %p1165_p8 }
  0x24   : > { %1173 = shalt.err (!%p1170_p10)
}
  0x25   : > { %s1174_s11 = scalar_lea.vmem %s133_s29, 16384  ;;  %p1182_p11 = scmp.lt.s32.totalorder %s133_s29, %s133_s29 }
  0x26   : > { %p1175_p1 = scmp.ne.s32.totalorder %s133_s29, %s1174_s11  ;;  %p1183_p6 = scmp.lt.s32.totalorder %s1174_s11, %s1174_s11 }
  0x28   : > { %p1177_p4 = pnand %p1175_p1, %p1163_p3  ;;  %p1184_p13 = por %p1183_p6, %p1182_p11 }
  0x2a   : > { %p1178_p12 = pneg %p1177_p4 }
  0x2c   : > { %p1185_p5 = pnand %p1184_p13, %p1178_p12 }
  0x2e   : > { %1188 = shalt.err (!%p1185_p5)
}
  0x2f   : > { %s1290_s12 = smov 128   ;;  %s1291_s13 = smov 8  }
  0x30   : > { %1106 = dma.hbm_to_vmem [thread:$0]  (!%p1389_p2), %s1550_s1, 16384, %s133_s29, [#allocation7], %s1290_s12, %s1290_s12, %s1291_s13  }
  0x31   : > { %p790_p0 = scmp.ge.s32.totalorder %s1287_s17, 3 }
  0x32   : > { %p1562_p7 = scmp.ne.s32.totalorder (!%p790_p0), %s1556_s23, 0 }
  0x33   : > { %145 = sbr.rel (%p790_p0) target bundleno = 93 (0x5d), region = 24 }
  0x3a   : > { %148 = sbr.rel (!%p1562_p7) target bundleno = 93 (0x5d), region = 28  ;;  %s149_s21 = sand.u32 (%p1562_p7), 1, %s1283_s16  }
  0x3b   : > { %s792_s28 = sshll.u32 (%p1562_p7), %s1287_s17, 1  ;;  %s791_s4 = sshll.u32 (%p1562_p7), %s149_s21, 7 }
  0x3c   : > { %s155_s5 = ssub.s32 (%p1562_p7), 5, %s792_s28  ;;  %s1417_s7 = scalar_lea.sflag (%p1562_p7), [#allocation4], %s149_s21 }
  0x3d   : > { %p156_p4 = scmp.lt.s32.totalorder (%p1562_p7), %s155_s5, 2  ;;  %s153_s29 = scalar_lea.vmem (%p1562_p7), [#allocation3], %s791_s4 }
  0x41   : > { %s1574_s5 = smov (!%p156_p4, %s155_s5), 2 }
  0x42   : > { %s1414_s6 = sshll.u32 %s1574_s5, 10 }
  0x43   : > { %s161_s30 = ssub.s32 2048, %s1414_s6 }
  0x44   : > { %162 = vsyncadd %s1417_s7, %s161_s30  ;;  %p795_p5 = scmp.ne.s32.totalorder %s1414_s6, 0  ;;  %s815_s23 = sshll.u32 %s1287_s17, 11 }
  0x45   : > { %s1425_s10 = scalar_lea.hbm %s1549_s0, %s815_s23  ;;  %s168_s11 = sshll.u32 %s153_s29, 4  ;;  %s1427_s11 = int_to_ptr.vmem [resolvable:$true] %s168_s11 }
  0x46   : > { %s1189_s12 = scalar_lea.hbm %s1425_s10, %s1414_s6  ;;  %s1193_s20 = scalar_lea.hbm %s1549_s0, 5120 }
  0x47   : > { %p1190_p6 = scmp.ne.s32.totalorder %s1425_s10, %s1189_s12  ;;  %p1194_p13 = scmp.lt.u32.totalorder %s1425_s10, %s1549_s0 }
  0x48   : > { %p1195_p2 = scmp.lt.u32.totalorder %s1193_s20, %s1189_s12  ;;  %p1197_p8 = scmp.lt.u32.totalorder %s1189_s12, %s1425_s10 }
  0x49   : > { %p1191_p11 = pnand %p1190_p6, %p795_p5 }
  0x4a   : > { %p1196_p3 = por %p1195_p2, %p1194_p13 }
  0x4b   : > { %p1192_p12 = pneg %p1191_p11 }
  0x4c   : > { %p1198_p9 = por %p1197_p8, %p1196_p3 }
  0x4e   : > { %p1199_p10 = pnand %p1198_p9, %p1192_p12 }
  0x50   : > { %1202 = shalt.err (!%p1199_p10)
}
  0x51   : > { %s1203_s4 = scalar_lea.vmem %s1427_s11, %s1414_s6  ;;  %s1292_s5 = smov [#allocation3]  }
  0x52   : > { %p1204_p1 = scmp.ne.s32.totalorder %s1427_s11, %s1203_s4  ;;  %s1207_s30 = sshll.u32 %s1292_s5, 4  ;;  %s1208_s30 = int_to_ptr.vmem [resolvable:$false] %s1207_s30 }
  0x53   : > { %s1209_s29 = scalar_lea.vmem %s1208_s30, 4096  ;;  %p1210_p4 = scmp.lt.s32.totalorder %s1427_s11, %s1208_s30 }
  0x54   : > { %p1205_p0 = pnand %p1204_p1, %p795_p5  ;;  %p1211_p6 = scmp.lt.s32.totalorder %s1209_s29, %s1203_s4 }
  0x56   : > { %p1206_p7 = pneg %p1205_p0  ;;  %p1212_p11 = por %p1211_p6, %p1210_p4 }
  0x58   : > { %p1213_p13 = pnand %p1212_p11, %p1206_p7 }
  0x5a   : > { %1216 = shalt.err (!%p1213_p13)
}
  0x5b   : > { %s1293_s23 = smov 1024   ;;  %s1294_s8 = smov 64  }
  0x5c   : > { %174 = dma.hbm_to_vmem [thread:$0]  (%p795_p5), %s1425_s10, %s1414_s6, %s1427_s11, %s1417_s7, %s1293_s23, %s1293_s23, %s1294_s8  }
  0x5d PF: > { %p1563_p12 = scmp.ne.s32.totalorder %s1560_s27, 0 }
  0x5e   : > { %s1457_s9 = sand.u32 (!%p1563_p12), 1, %s1279_s15   ;;  %p1564_p2 = scmp.ne.s32.totalorder (!%p1563_p12), %s1557_s24, 0 }
  0x5f   : > { %180 = sbr.rel (%p1563_p12) target bundleno = 453 (0x1c5), region = 32  ;;  %s801_s12 = sshll.u32 (!%p1563_p12), %s1457_s9, 7 }
  0x60   : > { %s183_s13 = scalar_lea.sflag (!%p1563_p12), [#allocation4], %s1457_s9  ;;  %s1461_s18 = scalar_lea.vmem (!%p1563_p12), [#allocation3], %s801_s12 }
  0x66   : > { %1262 = dma.done.wait (%p1564_p2), %s183_s13, 2048  }
  0x67   : > { %1264 = vsyncadd (%p1564_p2), %s183_s13, 4294965248  ;;  %p1565_p5 = scmp.eq.s32.totalorder %s1342_s2, 0 }
  0x69   : > { %1266 = dma.done.wait (%p1565_p5), [#allocation7], 16384   ;;  %p1566_p3 = pmov %p1565_p5 }
  0x6a   : > { %v256_v0 = vld [vmem:[#allocation6 + $0x80] sm:$0xff]  ;;  %v257_v1 = vld [vmem:[#allocation6 + $0x88] sm:$0xff]  ;;  %v258_v11 = vld [vmem:[#allocation6 + $0x90] sm:$0xff]  ;;  %s368_s24 = sld [smem:[#allocation2]]  ;;  %s803_s27 = sshll.u32 %s1457_s9, 4 }
  0x6b   : > { %1268 = vsyncadd (%p1566_p3), [#allocation7], 4294950912  ;;  %v240_v2 = vld [vmem:[#allocation6] sm:$0xff]  ;;  %v969_v3 = vpack.c.bf16 %v257_v1, %v256_v0  ;;  %v241_v4 = vld [vmem:[#allocation6 + $0x8] sm:$0xff]  ;;  %s212_s6 = scalar_lea.vmem [#allocation8], %s803_s27  ;;  %s685_s7 = scalar_lea.sflag [#allocation5], %s1457_s9 }
  0x6c   : > { %v288_v5 = vld [vmem:[#allocation6 + $0x180] sm:$0xff]  ;;  %v289_v6 = vld [vmem:[#allocation6 + $0x188] sm:$0xff]  ;;  %v971_v7 = vpack.c.bf16 %v241_v4, %v240_v2  ;;  %v259_v13 = vld [vmem:[#allocation6 + $0x98] sm:$0xff]  ;;  %p1567_p8 = scmp.ne.s32.totalorder %s1558_s25, 0 }
  0x6d   : > { %v1001_v8 = vpack.c.bf16 %v289_v6, %v288_v5  ;;  %v272_v9 = vld [vmem:[#allocation6 + $0x100] sm:$0xff]  ;;  %v273_v10 = vld [vmem:[#allocation6 + $0x108] sm:$0xff]  ;;  %970 = vmatprep.subr.bf16.mxu0 %v969_v3  ;;  %v242_v14 = vld [vmem:[#allocation6 + $0x10] sm:$0xff]  ;;  %v973_v16 = vpack.c.bf16 %v259_v13, %v258_v11  ;;  %s805_s10 = sshll.u32 (%p1567_p8), %s1342_s2, 1 }
  0x6e   : > { %v1003_v12 = vpack.c.bf16 %v273_v10, %v272_v9  ;;  %v243_v15 = vld [vmem:[#allocation6 + $0x18] sm:$0xff]  ;;  %972 = vmatpush3.bf16.msra.mxu0 %v971_v7  ;;  %v290_v18 = vld [vmem:[#allocation6 + $0x190] sm:$0xff]  ;;  %v260_v23 = vld [vmem:[#allocation6 + $0xa0] sm:$0xff]  ;;  %s693_s11 = ssub.s32 (%p1567_p8), 5, %s805_s10 }
  0x6f   : > { %1002 = vmatprep.subr.bf16.mxu1 %v1001_v8  ;;  %v975_v17 = vpack.c.bf16 %v243_v15, %v242_v14  ;;  %v291_v19 = vld [vmem:[#allocation6 + $0x198] sm:$0xff]  ;;  %v274_v20 = vld [vmem:[#allocation6 + $0x110] sm:$0xff]  ;;  %v261_v24 = vld [vmem:[#allocation6 + $0xa8] sm:$0xff]  ;;  %974 = vmatprep.subr.bf16.mxu0 %v973_v16  ;;  %p694_p9 = scmp.lt.s32.totalorder (%p1567_p8), %s693_s11, 2 }
  0x70   : > { %1004 = vmatpush3.bf16.msra.mxu1 %v1003_v12  ;;  %v1005_v21 = vpack.c.bf16 %v291_v19, %v290_v18  ;;  %v275_v22 = vld [vmem:[#allocation6 + $0x118] sm:$0xff]  ;;  %v977_v26 = vpack.c.bf16 %v261_v24, %v260_v23  ;;  %v244_v27 = vld [vmem:[#allocation6 + $0x20] sm:$0xff]  ;;  %v245_v28 = vld [vmem:[#allocation6 + $0x28] sm:$0xff] }
  0x71   : > { %v1007_v25 = vpack.c.bf16 %v275_v22, %v274_v20  ;;  %v292_v29 = vld [vmem:[#allocation6 + $0x1a0] sm:$0xff]  ;;  %v293_v30 = vld [vmem:[#allocation6 + $0x1a8] sm:$0xff]  ;;  %v979_v33 = vpack.c.bf16 %v245_v28, %v244_v27  ;;  %v262_v35 = vld [vmem:[#allocation6 + $0xb0] sm:$0xff] }
  0x72   : > { %1006 = vmatprep.subr.bf16.mxu1 %v1005_v21  ;;  %v276_v31 = vld [vmem:[#allocation6 + $0x120] sm:$0xff]  ;;  %v277_v32 = vld [vmem:[#allocation6 + $0x128] sm:$0xff]  ;;  %976 = vmatpush3.bf16.msra.mxu0 %v975_v17  ;;  %v1009_v34 = vpack.c.bf16 %v293_v30, %v292_v29  ;;  %v263_v36 = vld [vmem:[#allocation6 + $0xb8] sm:$0xff] }
  0x73   : > { %v246_v37 = vld [vmem:[#allocation6 + $0x30] sm:$0xff]  ;;  %978 = vmatprep.subr.bf16.mxu0 %v977_v26  ;;  %v1011_v38 = vpack.c.bf16 %v277_v32, %v276_v31  ;;  %v981_v39 = vpack.c.bf16 %v263_v36, %v262_v35  ;;  %v247_v40 = vld [vmem:[#allocation6 + $0x38] sm:$0xff]  ;;  %v264_v46 = vld [vmem:[#allocation6 + $0xc0] sm:$0xff] }
  0x74   : > { %1008 = vmatpush3.bf16.msra.mxu1 %v1007_v25  ;;  %v294_v41 = vld [vmem:[#allocation6 + $0x1b0] sm:$0xff]  ;;  %v295_v42 = vld [vmem:[#allocation6 + $0x1b8] sm:$0xff]  ;;  %v265_v47 = vld [vmem:[#allocation6 + $0xc8] sm:$0xff]  ;;  %v983_v48 = vpack.c.bf16 %v247_v40, %v246_v37 }
  0x75   : > { %1010 = vmatprep.subr.bf16.mxu1 %v1009_v34  ;;  %v1013_v43 = vpack.c.bf16 %v295_v42, %v294_v41  ;;  %v278_v44 = vld [vmem:[#allocation6 + $0x130] sm:$0xff]  ;;  %v279_v45 = vld [vmem:[#allocation6 + $0x138] sm:$0xff]  ;;  %v296_v49 = vld [vmem:[#allocation6 + $0x1c0] sm:$0xff]  ;;  %v985_v52 = vpack.c.bf16 %v265_v47, %v264_v46 }
  0x76   : > { %980 = vmatpush3.bf16.msra.mxu0 %v979_v33  ;;  %v297_v50 = vld [vmem:[#allocation6 + $0x1c8] sm:$0xff]  ;;  %v1015_v51 = vpack.c.bf16 %v279_v45, %v278_v44  ;;  %v248_v53 = vld [vmem:[#allocation6 + $0x40] sm:$0xff]  ;;  %v266_v58 = vld [vmem:[#allocation6 + $0xd0] sm:$0xff] }
  0x77   : > { %982 = vmatprep.subr.bf16.mxu0 %v981_v39  ;;  %v249_v54 = vld [vmem:[#allocation6 + $0x48] sm:$0xff]  ;;  %v280_v55 = vld [vmem:[#allocation6 + $0x140] sm:$0xff]  ;;  %v1017_v56 = vpack.c.bf16 %v297_v50, %v296_v49  ;;  %v267_v59 = vld [vmem:[#allocation6 + $0xd8] sm:$0xff] }
  0x78   : > { %1012 = vmatpush3.bf16.msra.mxu1 %v1011_v38  ;;  %v281_v57 = vld [vmem:[#allocation6 + $0x148] sm:$0xff]  ;;  %v298_v60 = vld [vmem:[#allocation6 + $0x1d0] sm:$0xff]  ;;  %v299_v61 = vld [vmem:[#allocation6 + $0x1d8] sm:$0xff]  ;;  %v987_v62 = vpack.c.bf16 %v249_v54, %v248_v53  ;;  %v989_v0 = vpack.c.bf16 %v267_v59, %v266_v58 }
  0x79   : > { %1014 = vmatprep.subr.bf16.mxu1 %v1013_v43  ;;  %v1019_v63 = vpack.c.bf16 %v281_v57, %v280_v55  ;;  %v250_v1 = vld [vmem:[#allocation6 + $0x50] sm:$0xff]  ;;  %v251_v2 = vld [vmem:[#allocation6 + $0x58] sm:$0xff]  ;;  %v1021_v4 = vpack.c.bf16 %v299_v61, %v298_v60  ;;  %v268_v6 = vld [vmem:[#allocation6 + $0xe0] sm:$0xff] }
  0x7a   : > { %984 = vmatpush3.bf16.msra.mxu0 %v983_v48  ;;  %v282_v3 = vld [vmem:[#allocation6 + $0x150] sm:$0xff]  ;;  %v283_v5 = vld [vmem:[#allocation6 + $0x158] sm:$0xff]  ;;  %v269_v7 = vld [vmem:[#allocation6 + $0xe8] sm:$0xff]  ;;  %v991_v10 = vpack.c.bf16 %v251_v2, %v250_v1 }
  0x7b   : > { %986 = vmatprep.subr.bf16.mxu0 %v985_v52  ;;  %v300_v8 = vld [vmem:[#allocation6 + $0x1e0] sm:$0xff]  ;;  %v301_v9 = vld [vmem:[#allocation6 + $0x1e8] sm:$0xff]  ;;  %v1023_v13 = vpack.c.bf16 %v283_v5, %v282_v3  ;;  %v993_v14 = vpack.c.bf16 %v269_v7, %v268_v6  ;;  %v270_v19 = vld [vmem:[#allocation6 + $0xf0] sm:$0xff] }
  0x7c   : > { %1016 = vmatpush3.bf16.msra.mxu1 %v1015_v51  ;;  %v252_v11 = vld [vmem:[#allocation6 + $0x60] sm:$0xff]  ;;  %v253_v12 = vld [vmem:[#allocation6 + $0x68] sm:$0xff]  ;;  %v1025_v18 = vpack.c.bf16 %v301_v9, %v300_v8  ;;  %v271_v20 = vld [vmem:[#allocation6 + $0xf8] sm:$0xff] }
  0x7d   : > { %1018 = vmatprep.subr.bf16.mxu1 %v1017_v56  ;;  %v284_v15 = vld [vmem:[#allocation6 + $0x160] sm:$0xff]  ;;  %v285_v16 = vld [vmem:[#allocation6 + $0x168] sm:$0xff]  ;;  %v227_v21 = vld [vmem:[%s1461_s18 + $0x18] sm:$0xff]  ;;  %v995_v24 = vpack.c.bf16 %v253_v12, %v252_v11  ;;  %v997_v26 = vpack.c.bf16 %v271_v20, %v270_v19 }
  0x7e   : > { %988 = vmatpush3.bf16.msra.mxu0 %v987_v62  ;;  %v225_v17 = vld [vmem:[%s1461_s18 + $0x8] sm:$0xff]  ;;  %v302_v22 = vld [vmem:[#allocation6 + $0x1f0] sm:$0xff]  ;;  %v303_v23 = vld [vmem:[#allocation6 + $0x1f8] sm:$0xff]  ;;  %509 = vmatprep.mubr.f32.mxu1 %v227_v21  ;;  %v1027_v25 = vpack.c.bf16 %v285_v16, %v284_v15 }
  0x7f   : > { %990 = vmatprep.subr.bf16.mxu0 %v989_v0  ;;  %434 = vmatprep.mubr.f32.mxu0 %v225_v17  ;;  %v254_v27 = vld [vmem:[#allocation6 + $0x70] sm:$0xff]  ;;  %v255_v28 = vld [vmem:[#allocation6 + $0x78] sm:$0xff]  ;;  %v1029_v30 = vpack.c.bf16 %v303_v23, %v302_v22  ;;  %v320_v32 = vld [vmem:[#allocation6 + $0x280] sm:$0xff] }
  0x80   : > { %1020 = vmatpush3.bf16.msra.mxu1 %v1019_v63  ;;  %v286_v29 = vld [vmem:[#allocation6 + $0x170] sm:$0xff]  ;;  %v287_v31 = vld [vmem:[#allocation6 + $0x178] sm:$0xff]  ;;  %v321_v33 = vld [vmem:[#allocation6 + $0x288] sm:$0xff]  ;;  %v999_v36 = vpack.c.bf16 %v255_v28, %v254_v27 }
  0x81   : > { %1022 = vmatprep.subr.bf16.mxu1 %v1021_v4  ;;  %v352_v34 = vld [vmem:[#allocation6 + $0x380] sm:$0xff]  ;;  %v353_v35 = vld [vmem:[#allocation6 + $0x388] sm:$0xff]  ;;  %v1031_v37 = vpack.c.bf16 %v287_v31, %v286_v29  ;;  %v1033_v38 = vpack.c.bf16 %v321_v33, %v320_v32  ;;  %v322_v44 = vld [vmem:[#allocation6 + $0x290] sm:$0xff] }
  0x82   : > { %992 = vmatpush3.bf16.msra.mxu0 %v991_v10  ;;  %v304_v39 = vld [vmem:[#allocation6 + $0x200] sm:$0xff]  ;;  %v305_v40 = vld [vmem:[#allocation6 + $0x208] sm:$0xff]  ;;  %v1065_v42 = vpack.c.bf16 %v353_v35, %v352_v34  ;;  %v323_v45 = vld [vmem:[#allocation6 + $0x298] sm:$0xff] }
  0x83   : > { %994 = vmatprep.subr.bf16.mxu0 %v993_v14  ;;  %v336_v41 = vld [vmem:[#allocation6 + $0x300] sm:$0xff]  ;;  %v337_v43 = vld [vmem:[#allocation6 + $0x308] sm:$0xff]  ;;  %v354_v46 = vld [vmem:[#allocation6 + $0x390] sm:$0xff]  ;;  %v1035_v49 = vpack.c.bf16 %v305_v40, %v304_v39  ;;  %v1037_v52 = vpack.c.bf16 %v323_v45, %v322_v44 }
  0x84   : > { %1024 = vmatpush3.bf16.msra.mxu1 %v1023_v13  ;;  %v355_v47 = vld [vmem:[#allocation6 + $0x398] sm:$0xff]  ;;  %v224_v48 = vld [vmem:[%s1461_s18] sm:$0xff]  ;;  %v226_v50 = vld [vmem:[%s1461_s18 + $0x10] sm:$0xff]  ;;  %v1067_v51 = vpack.c.bf16 %v337_v43, %v336_v41 }
  0x85   : > { %1026 = vmatprep.subr.bf16.mxu1 %v1025_v18  ;;  %v306_v53 = vld [vmem:[#allocation6 + $0x210] sm:$0xff]  ;;  %v307_v54 = vld [vmem:[#allocation6 + $0x218] sm:$0xff]  ;;  %v1069_v56 = vpack.c.bf16 %v355_v47, %v354_v46  ;;  %v324_v58 = vld [vmem:[#allocation6 + $0x2a0] sm:$0xff] }
  0x86   : > { %996 = vmatpush3.bf16.msra.mxu0 %v995_v24  ;;  %v338_v55 = vld [vmem:[#allocation6 + $0x310] sm:$0xff]  ;;  %v339_v57 = vld [vmem:[#allocation6 + $0x318] sm:$0xff]  ;;  %v325_v59 = vld [vmem:[#allocation6 + $0x2a8] sm:$0xff]  ;;  %v1039_v62 = vpack.c.bf16 %v307_v54, %v306_v53 }
  0x87   : > { %998 = vmatprep.subr.bf16.mxu0 %v997_v26  ;;  %v356_v60 = vld [vmem:[#allocation6 + $0x3a0] sm:$0xff]  ;;  %v357_v61 = vld [vmem:[#allocation6 + $0x3a8] sm:$0xff]  ;;  %v1071_v63 = vpack.c.bf16 %v339_v57, %v338_v55  ;;  %v1041_v0 = vpack.c.bf16 %v325_v59, %v324_v58  ;;  %v326_v6 = vld [vmem:[#allocation6 + $0x2b0] sm:$0xff] }
  0x88   : > { %1028 = vmatpush3.bf16.msra.mxu1 %v1027_v25  ;;  %v308_v1 = vld [vmem:[#allocation6 + $0x220] sm:$0xff]  ;;  %v309_v2 = vld [vmem:[#allocation6 + $0x228] sm:$0xff]  ;;  %v1073_v4 = vpack.c.bf16 %v357_v61, %v356_v60  ;;  %v327_v7 = vld [vmem:[#allocation6 + $0x2b8] sm:$0xff] }
  0x89   : > { %1030 = vmatprep.subr.bf16.mxu1 %v1029_v30  ;;  %v340_v3 = vld [vmem:[#allocation6 + $0x320] sm:$0xff]  ;;  %v341_v5 = vld [vmem:[#allocation6 + $0x328] sm:$0xff]  ;;  %v358_v8 = vld [vmem:[#allocation6 + $0x3b0] sm:$0xff]  ;;  %v1043_v10 = vpack.c.bf16 %v309_v2, %v308_v1  ;;  %v1045_v15 = vpack.c.bf16 %v327_v7, %v326_v6 }
  0x8a   : > { %1000 = vmatpush3.bf16.msra.mxu0 %v999_v36  ;;  %v359_v9 = vld [vmem:[#allocation6 + $0x3b8] sm:$0xff]  ;;  %v310_v11 = vld [vmem:[#allocation6 + $0x230] sm:$0xff]  ;;  %v233_v13 = vld [vmem:[%s1461_s18 + $0x48] sm:$0xff]  ;;  %v1075_v14 = vpack.c.bf16 %v341_v5, %v340_v3 }
  0x8b   : > { %1034 = vmatprep.subr.bf16.mxu0 %v1033_v38  ;;  %v311_v12 = vld [vmem:[#allocation6 + $0x238] sm:$0xff]  ;;  %v342_v16 = vld [vmem:[#allocation6 + $0x330] sm:$0xff]  ;;  %v232_v18 = vld [vmem:[%s1461_s18 + $0x40] sm:$0xff]  ;;  %v1077_v19 = vpack.c.bf16 %v359_v9, %v358_v8 }
  0x8c   : > { %1032 = vmatpush3.bf16.msra.mxu1 %v1031_v37  ;;  %v343_v17 = vld [vmem:[#allocation6 + $0x338] sm:$0xff]  ;;  %v328_v20 = vld [vmem:[#allocation6 + $0x2c0] sm:$0xff]  ;;  %v329_v21 = vld [vmem:[#allocation6 + $0x2c8] sm:$0xff]  ;;  %v1047_v26 = vpack.c.bf16 %v311_v12, %v310_v11 }
  0x8d   : > { %1066 = vmatprep.subr.bf16.mxu1 %v1065_v42  ;;  %435 = vmatmul.mubr.f32.vlgmr.msra.gmra.mrb[0].mxu0 %v224_v48  ;;  %v235_v22 = vld [vmem:[%s1461_s18 + $0x58] sm:$0xff]  ;;  %v360_v23 = vld [vmem:[#allocation6 + $0x3c0] sm:$0xff]  ;;  %v361_v24 = vld [vmem:[#allocation6 + $0x3c8] sm:$0xff]  ;;  %v1079_v29 = vpack.c.bf16 %v343_v17, %v342_v16  ;;  %v1049_v30 = vpack.c.bf16 %v329_v21, %v328_v20  ;;  %v369_v17 = vstv %s368_s24 }
  0x8e   : > { %1036 = vmatpush3.bf16.msra.mxu0 %v1035_v49  ;;  %439 = vmatprep.mubr.f32.mxu0 %v233_v13  ;;  %v234_v25 = vld [vmem:[%s1461_s18 + $0x50] sm:$0xff]  ;;  %v312_v27 = vld [vmem:[#allocation6 + $0x240] sm:$0xff]  ;;  %v313_v28 = vld [vmem:[#allocation6 + $0x248] sm:$0xff]  ;;  %v1081_v34 = vpack.c.bf16 %v361_v24, %v360_v23 }
  0x8f   : > { %510 = vmatmul.mubr.f32.vlgmr.msra.gmra.mrb[0].mxu1 %v226_v50  ;;  %1038 = vmatprep.subr.bf16.mxu0 %v1037_v52  ;;  %v344_v31 = vld [vmem:[#allocation6 + $0x340] sm:$0xff]  ;;  %v345_v32 = vld [vmem:[#allocation6 + $0x348] sm:$0xff]  ;;  %v330_v35 = vld [vmem:[#allocation6 + $0x2d0] sm:$0xff]  ;;  %v1051_v40 = vpack.c.bf16 %v313_v28, %v312_v27 }
  0x90   : > { %1068 = vmatpush3.bf16.msra.mxu1 %v1067_v51  ;;  %514 = vmatprep.mubr.f32.mxu1 %v235_v22  ;;  %v229_v33 = vld [vmem:[%s1461_s18 + $0x28] sm:$0xff]  ;;  %v331_v36 = vld [vmem:[#allocation6 + $0x2d8] sm:$0xff]  ;;  %v362_v38 = vld [vmem:[#allocation6 + $0x3d0] sm:$0xff]  ;;  %v1083_v41 = vpack.c.bf16 %v345_v32, %v344_v31 }
  0x91   : > { %1070 = vmatprep.subr.bf16.mxu1 %v1069_v56  ;;  %440 = vmatmul.mubr.f32.gmra.mrb[2].mxu0 %v232_v18  ;;  %v231_v37 = vld [vmem:[%s1461_s18 + $0x38] sm:$0xff]  ;;  %v1053_v42 = vpack.c.bf16 %v331_v36, %v330_v35  ;;  %v314_v43 = vld [vmem:[#allocation6 + $0x250] sm:$0xff]  ;;  %v332_v48 = vld [vmem:[#allocation6 + $0x2e0] sm:$0xff] }
  0x92   : > { %1040 = vmatpush3.bf16.msra.mxu0 %v1039_v62  ;;  %584 = vmatprep.mubr.f32.mxu0 %v229_v33  ;;  %v363_v39 = vld [vmem:[#allocation6 + $0x3d8] sm:$0xff]  ;;  %v346_v45 = vld [vmem:[#allocation6 + $0x350] sm:$0xff]  ;;  %v333_v49 = vld [vmem:[#allocation6 + $0x2e8] sm:$0xff] }
  0x93   : > { %1042 = vmatprep.subr.bf16.mxu0 %v1041_v0  ;;  %515 = vmatmul.mubr.f32.gmra.mrb[2].mxu1 %v234_v25  ;;  %v315_v44 = vld [vmem:[#allocation6 + $0x258] sm:$0xff]  ;;  %v1085_v46 = vpack.c.bf16 %v363_v39, %v362_v38  ;;  %v364_v50 = vld [vmem:[#allocation6 + $0x3e0] sm:$0xff]  ;;  %v365_v51 = vld [vmem:[#allocation6 + $0x3e8] sm:$0xff]  ;;  %v1057_v54 = vpack.c.bf16 %v333_v49, %v332_v48 }
  0x94   : > { %1072 = vmatpush3.bf16.msra.mxu1 %v1071_v63  ;;  %659 = vmatprep.mubr.f32.mxu1 %v231_v37  ;;  %v347_v47 = vld [vmem:[#allocation6 + $0x358] sm:$0xff]  ;;  %v1055_v52 = vpack.c.bf16 %v315_v44, %v314_v43  ;;  %v316_v55 = vld [vmem:[#allocation6 + $0x260] sm:$0xff]  ;;  %v317_v56 = vld [vmem:[#allocation6 + $0x268] sm:$0xff]  ;;  %v1089_v58 = vpack.c.bf16 %v365_v51, %v364_v50 }
  0x95   : > { %1074 = vmatprep.subr.bf16.mxu1 %v1073_v4  ;;  %v1087_v53 = vpack.c.bf16 %v347_v47, %v346_v45  ;;  %v348_v57 = vld [vmem:[#allocation6 + $0x360] sm:$0xff]  ;;  %v349_v59 = vld [vmem:[#allocation6 + $0x368] sm:$0xff]  ;;  %v334_v60 = vld [vmem:[#allocation6 + $0x2f0] sm:$0xff]  ;;  %v1059_v0 = vpack.c.bf16 %v317_v56, %v316_v55 }
  0x96   : > { %1044 = vmatpush3.bf16.msra.mxu0 %v1043_v10  ;;  %v335_v61 = vld [vmem:[#allocation6 + $0x2f8] sm:$0xff]  ;;  %v366_v62 = vld [vmem:[#allocation6 + $0x3f0] sm:$0xff]  ;;  %v1091_v1 = vpack.c.bf16 %v349_v59, %v348_v57  ;;  %v228_v10 = vld [vmem:[%s1461_s18 + $0x20] sm:$0xff] }
  0x97   : > { %1046 = vmatprep.subr.bf16.mxu0 %v1045_v15  ;;  %v367_v63 = vld [vmem:[#allocation6 + $0x3f8] sm:$0xff]  ;;  %v1061_v2 = vpack.c.bf16 %v335_v61, %v334_v60  ;;  %v318_v3 = vld [vmem:[#allocation6 + $0x270] sm:$0xff]  ;;  %v237_v12 = vld [vmem:[%s1461_s18 + $0x68] sm:$0xff] }
  0x98   : > { %1076 = vmatpush3.bf16.msra.mxu1 %v1075_v14  ;;  %v319_v4 = vld [vmem:[#allocation6 + $0x278] sm:$0xff]  ;;  %v1093_v5 = vpack.c.bf16 %v367_v63, %v366_v62  ;;  %v350_v6 = vld [vmem:[#allocation6 + $0x370] sm:$0xff]  ;;  %v236_v14 = vld [vmem:[%s1461_s18 + $0x60] sm:$0xff] }
  0x99   : > { %1078 = vmatprep.subr.bf16.mxu1 %v1077_v19  ;;  %v351_v7 = vld [vmem:[#allocation6 + $0x378] sm:$0xff]  ;;  %v1063_v8 = vpack.c.bf16 %v319_v4, %v318_v3  ;;  %v230_v11 = vld [vmem:[%s1461_s18 + $0x30] sm:$0xff] }
  0x9a   : > { %1048 = vmatpush3.bf16.msra.mxu0 %v1047_v26  ;;  %v1095_v9 = vpack.c.bf16 %v351_v7, %v350_v6  ;;  %v239_v13 = vld [vmem:[%s1461_s18 + $0x78] sm:$0xff]  ;;  %v238_v15 = vld [vmem:[%s1461_s18 + $0x70] sm:$0xff] }
  0x9b   : > { %1050 = vmatprep.subr.bf16.mxu0 %v1049_v30 }
  0x9c   : > { %1080 = vmatpush3.bf16.msra.mxu1 %v1079_v29 }
  0x9d   : > { %1082 = vmatprep.subr.bf16.mxu1 %v1081_v34 }
  0x9e   : > { %1052 = vmatpush3.bf16.msra.mxu0 %v1051_v40 }
  0x9f   : > { %1054 = vmatprep.subr.bf16.mxu0 %v1053_v42 }
  0xa0   : > { %1084 = vmatpush3.bf16.msra.mxu1 %v1083_v41 }
  0xa1   : > { %1086 = vmatprep.subr.bf16.mxu1 %v1085_v46 }
  0xa2   : > { %1056 = vmatpush3.bf16.msra.mxu0 %v1055_v52 }
  0xa3   : > { %1058 = vmatprep.subr.bf16.mxu0 %v1057_v54 }
  0xa4   : > { %1088 = vmatpush3.bf16.msra.mxu1 %v1087_v53 }
  0xa5   : > { %1090 = vmatprep.subr.bf16.mxu1 %v1089_v58 }
  0xa6   : > { %1060 = vmatpush3.bf16.msra.mxu0 %v1059_v0 }
  0xa7   : > { %1062 = vmatprep.subr.bf16.mxu0 %v1061_v2 }
  0xa8   : > { %1092 = vmatpush3.bf16.msra.mxu1 %v1091_v1 }
  0xa9   : > { %1094 = vmatprep.subr.bf16.mxu1 %v1093_v5 }
  0xaa   : > { %1064 = vmatpush3.bf16.msra.mxu0 %v1063_v8 }
  0xac   : > { %1096 = vmatpush3.bf16.msra.mxu1 %v1095_v9 }
  0xad   : > { %585 = vmatmul.mubr.f32.vlgmr.msra.gmra.mrb[4].mxu0 %v228_v10 }
  0xae   : > { %589 = vmatprep.mubr.f32.mxu0 %v237_v12 }
  0xaf   : > { %660 = vmatmul.mubr.f32.vlgmr.msra.gmra.mrb[4].mxu1 %v230_v11 }
  0xb0   : > { %664 = vmatprep.mubr.f32.mxu1 %v239_v13 }
  0xb1   : > { %590 = vmatmul.mubr.f32.gmra.mrb[6].mxu0 %v236_v14 }
  0xb3   : > { %665 = vmatmul.mubr.f32.gmra.mrb[6].mxu1 %v238_v15 }
 0x160   : > { %v849_v16 = vpop.f32.mrb[0].mxu0 }
 0x161   : > { %v850_v18 = vpop.f32.mrb[1].mxu0 }
 0x162   : > { %v887_v19 = vpop.f32.mrb[0].mxu1  ;;  %v851_v20 = vadd.f32 %v850_v18, %v849_v16 }
 0x163   : > { %v888_v21 = vpop.f32.mrb[1].mxu1 }
 0x164   : > { %v889_v22 = vadd.f32 %v888_v21, %v887_v19  ;;  %v437_v23 = vadd.f32 %v851_v20, %v369_v17  ;;  %v852_v25 = vpop.f32.mrb[2].mxu0 }
 0x165   : > { %v853_v26 = vpop.f32.mrb[3].mxu0 }
 0x166   : > { %v512_v24 = vadd.f32 %v889_v22, %v437_v23  ;;  %v890_v27 = vpop.f32.mrb[2].mxu1  ;;  %v854_v28 = vadd.f32 %v853_v26, %v852_v25 }
 0x167   : > { %v891_v29 = vpop.f32.mrb[3].mxu1 }
 0x168   : > { %v892_v30 = vadd.f32 %v891_v29, %v890_v27  ;;  %v442_v31 = vadd.f32 %v854_v28, %v369_v17 }
 0x16a   : > { %v517_v32 = vadd.f32 %v892_v30, %v442_v31 }
 0x180   : > { %v925_v33 = vpop.f32.mrb[4].mxu0 }
 0x181   : > { %v926_v34 = vpop.f32.mrb[5].mxu0 }
 0x182   : > { %v963_v35 = vpop.f32.mrb[4].mxu1  ;;  %v927_v36 = vadd.f32 %v926_v34, %v925_v33 }
 0x183   : > { %v964_v37 = vpop.f32.mrb[5].mxu1 }
 0x184   : > { %v965_v38 = vadd.f32 %v964_v37, %v963_v35  ;;  %v587_v39 = vadd.f32 %v927_v36, %v512_v24  ;;  %v928_v40 = vpop.f32.mrb[6].mxu0 }
 0x185   : > { %v929_v41 = vpop.f32.mrb[7].mxu0 }
 0x186   : > { %v966_v42 = vpop.f32.mrb[6].mxu1  ;;  %v662_v43 = vadd.f32 %v965_v38, %v587_v39  ;;  %v930_v44 = vadd.f32 %v929_v41, %v928_v40 }
 0x187   : > { %v967_v45 = vpop.f32.mrb[7].mxu1 }
 0x188   : > { %v968_v46 = vadd.f32 %v967_v45, %v966_v42  ;;  %v670_v47 = vsub.f32 0.0, %v662_v43  ;;  %v592_v48 = vadd.f32 %v930_v44, %v517_v32 }
 0x18a   : > { %v672_v49 = vmul.f32 1.442695, %v670_v47  ;;  %v667_v50 = vadd.f32 %v968_v46, %v592_v48 }
 0x18c   : > { %1153 = vpow2.f32 %v672_v49  ;;  %v671_v51 = vsub.f32 0.0, %v667_v50 }
 0x18e   : > { %v674_v52 = vmul.f32 1.442695, %v671_v51 }
 0x190   : > { %1155 = vpow2.f32 %v674_v52 }
 0x196   : > { %v1154_v53 = vpop.eup %1153 }
 0x197   : > { %v676_v54 = vadd.f32 1.0, %v1154_v53 }
 0x199   : > { %1157 = vrcp.f32 %v676_v54 }
 0x19a   : > { %v1156_v55 = vpop.eup %1155 }
 0x19b   : > { %v677_v56 = vadd.f32 1.0, %v1156_v55 }
 0x19d   : > { %1159 = vrcp.f32 %v677_v56 }
 0x1a2   : > { %691 = sbr.rel (!%p1567_p8) target bundleno = 453 (0x1c5), region = 44 }
 0x1a3   : > { %v1158_v57 = vpop.eup %1157 }
 0x1a4   : > { %682 = vst [vmem:[%s212_s6] sm:$0xff] %v1158_v57 }
 0x1a7   : > { %v1160_v58 = vpop.eup %1159 }
 0x1a8   : > { %683 = vst [vmem:[%s212_s6 + $0x8] sm:$0xff] %v1160_v58 }
 0x1a9   : > { %s1576_s11 = smov (!%p694_p9, %s693_s11), 2 }
 0x1aa   : > { %s1492_s20 = sshll.u32 %s1576_s11, 7 }
 0x1ab   : > { %s698_s21 = ssub.s32 256, %s1492_s20 }
 0x1ac   : > { %699 = vsyncadd %s685_s7, %s698_s21  ;;  %p807_p10 = scmp.ne.s32.totalorder %s1492_s20, 0  ;;  %s816_s28 = sshll.u32 %s1342_s2, 8 }
 0x1ad   : > { %s1502_s5 = scalar_lea.hbm %s1552_s3, %s816_s28  ;;  %s704_s30 = sshll.u32 %s212_s6, 4  ;;  %s1504_s30 = int_to_ptr.vmem [resolvable:$true] %s704_s30 }
 0x1ae   : > { %s1217_s29 = scalar_lea.vmem %s1504_s30, %s1492_s20  ;;  %s1295_s23 = smov [#allocation8]  }
 0x1af   : > { %p1218_p1 = scmp.ne.s32.totalorder %s1504_s30, %s1217_s29  ;;  %s1221_s8 = sshll.u32 %s1295_s23, 4  ;;  %s1222_s8 = int_to_ptr.vmem [resolvable:$false] %s1221_s8 }
 0x1b0   : > { %s1223_s2 = scalar_lea.vmem %s1222_s8, 512  ;;  %p1224_p4 = scmp.lt.s32.totalorder %s1504_s30, %s1222_s8 }
 0x1b1   : > { %p1219_p0 = pnand %p1218_p1, %p807_p10  ;;  %p1225_p6 = scmp.lt.s32.totalorder %s1223_s2, %s1217_s29 }
 0x1b3   : > { %p1220_p7 = pneg %p1219_p0  ;;  %p1226_p11 = por %p1225_p6, %p1224_p4 }
 0x1b5   : > { %p1227_p13 = pnand %p1226_p11, %p1220_p7 }
 0x1b7   : > { %1230 = shalt.err (!%p1227_p13)
}
 0x1b8   : > { %s1231_s12 = scalar_lea.hbm %s1502_s5, %s1492_s20  ;;  %s1235_s24 = scalar_lea.hbm %s1552_s3, 640 }
 0x1b9   : > { %p1232_p12 = scmp.ne.s32.totalorder %s1502_s5, %s1231_s12  ;;  %p1236_p3 = scmp.lt.u32.totalorder %s1502_s5, %s1552_s3 }
 0x1ba   : > { %p1237_p8 = scmp.lt.u32.totalorder %s1235_s24, %s1231_s12  ;;  %p1239_p1 = scmp.lt.u32.totalorder %s1231_s12, %s1502_s5 }
 0x1bb   : > { %p1233_p2 = pnand %p1232_p12, %p807_p10 }
 0x1bc   : > { %p1238_p9 = por %p1237_p8, %p1236_p3 }
 0x1bd   : > { %p1234_p5 = pneg %p1233_p2 }
 0x1be   : > { %p1240_p0 = por %p1239_p1, %p1238_p9 }
 0x1c0   : > { %p1241_p7 = pnand %p1240_p0, %p1234_p5 }
 0x1c2   : > { %1244 = shalt.err (!%p1241_p7)
}
 0x1c3   : > { %s1296_s10 = smov 128   ;;  %s1297_s11 = smov 8  }
 0x1c4   : > { %710 = dma.vmem_to_hbm [thread:$0]  (%p807_p10), %s1504_s30, %s1492_s20, %s1502_s5, %s685_s7, %s1296_s10, %s1296_s10, %s1297_s11  }
 0x1c5 PF: > { %p1113_p4 = scmp.ge.s32.totalorder %s1287_s17, 2  ;;  %s719_s21 = sand.u32 1, %s1275_s14  }
 0x1c6   : > { %p1568_p6 = scmp.ne.s32.totalorder %s1559_s26, 0  ;;  %s720_s28 = scalar_lea.sflag [#allocation5], %s719_s21 }
 0x1c8   : > { %p1108_p11 = pnand %p1113_p4, %p1568_p6 }
 0x1ca   : > { %1270 = dma.done.wait (!%p1108_p11), %s720_s28, 256  }
 0x1cb   : > { %1272 = vsyncadd (!%p1108_p11), %s720_s28, 4294967040  ;;  %p18_p13 = scmp.ge.s32.totalorder %s1346_s19, 5   ;;  %s1569_s14 = smov %s1279_s15 }
 0x1cc   : > { %s1570_s15 = smov %s1283_s16  ;;  %s1571_s16 = smov %s1358_s22 }
 0x1cd   : > { %s1572_s17 = smov %s1346_s19  ;;  %20 = sbr.rel (!%p18_p13) target bundleno = 8 (0x8), region = 81 }
 0x1d4   :  { %725 = vsyncpa [#allocation4], 1 }
 0x1d5   :  { %727 = vsyncpa [#allocation4 + $0x1], 1 }
 0x1d6   :  { %728 = vsyncpa [#allocation7], 1 }
 0x1d7   :  { %729 = vsyncpa [#allocation5], 1 }
 0x1d8   :  { %731 = vsyncpa [#allocation5 + $0x1], 1 }

</bundles_post_ra>
